<compile_context>
chip_gen: v6e
topology: v6e:2x2x1
jax: 0.10.0
libtpu: 0.0.40
codegen_flags: <defaults>
</compile_context>

<pallas_src>
import functools

import jax
import jax.numpy as jnp
from jax import lax
from jax.experimental import pallas as pl
from jax.experimental.pallas import tpu as pltpu

_TARGET_STEP_BYTES = 4 * 1024 * 1024   # >= ~4 MiB of in+out HBM traffic per grid step
_STEPS_PER_CORE = 4                    # target pipelined steps per TensorCore (v7x megacore)
_MIN_PALLAS_BYTES = 1 << 20            # below this input size, use the plain-XLA fast path


def _round_up(n: int, m: int) -> int:
    return ((n + m - 1) // m) * m


@functools.lru_cache(maxsize=None)
def _tpu_config():
    """Return (vmem_tile_budget_bytes, vmem_limit_bytes, num_tensorcores_per_device)."""
    kind = ""
    try:
        kind = jax.devices()[0].device_kind.lower()
    except Exception:
        pass
    # v7x (and older megacore v4/v5p) expose 2 TensorCores behind one device; v5e/v6e are
    # single-TC, so forcing extra grid steps there only adds per-step overhead.
    num_cores = 2 if any(t in kind for t in ("v7", "7x", "v4", "v5p")) else 1

    vmem_bytes = None
    try:
        vmem_bytes = getattr(pltpu.get_tpu_info(), "vmem_capacity_bytes", None)
    except Exception:
        vmem_bytes = None
    if vmem_bytes is None:
        vmem_bytes = (64 if ("v7" in kind or "7x" in kind) else 128) * (1 << 20)

    if vmem_bytes >= 100 * (1 << 20):
        # 128 MiB parts (v5e / v6e): big tile budget, explicit high scoped-VMEM limit
        # (v5e's default scoped limit is only 16 MiB, so the explicit limit matters).
        return 56 * (1 << 20), 100 * (1 << 20), num_cores
    # v7x: 64 MiB physical per TensorCore -> stay conservative.
    return 24 * (1 << 20), 48 * (1 << 20), num_cores


def _pick_tile_b(B: int, D: int, dtype, vmem_tile_budget: int, num_cores: int) -> int:
    """Batch-tile size: VMEM-bounded, per-step-traffic-aware, core-count-aware."""
    itemsize = jnp.dtype(dtype).itemsize
    row_mult = {4: 8, 2: 16, 1: 32}.get(itemsize, 8)
    if B <= row_mult:
        return int(max(1, B))  # block equal to the full batch dim is always legal

    # VMEM per block row: double-buffered input + output at storage dtype + one f32 working row.
    bytes_per_row = 4 * D * itemsize + D * 4
    vmem_rows = max(row_mult,
                    ((vmem_tile_budget // max(bytes_per_row, 1)) // row_mult) * row_mult)
    b_ceil = _round_up(B, row_mult)

    if num_cores <= 1:
        # Single TensorCore (v5e/v6e): the grid is a sequential loop -> biggest block that fits.
        return int(min(vmem_rows, b_ceil))

    # Multi-TC (v7x megacore): aim for ~_STEPS_PER_CORE balanced steps per core so each core's
    # BlockSpec double-buffer has DMA/compute overlap, but never let a step's HBM traffic drop
    # below _TARGET_STEP_BYTES (amortizes the ~0.35us fixed per-step pipeline overhead).
    min_traffic_rows = _round_up(
        max(1, _TARGET_STEP_BYTES // max(2 * D * itemsize, 1)), row_mult)
    tile_b = _round_up(pl.cdiv(B, num_cores * _STEPS_PER_CORE), row_mult)
    tile_b = max(tile_b, min_traffic_rows)
    tile_b = min(tile_b, vmem_rows, b_ceil)
    return int(max(row_mult, tile_b))


def _normalize_kernel(x_ref, o_ref, *, power):
    # x_ref / o_ref: (TILE_B, D) block in VMEM; feature reduction is along the lane axis.
    x = x_ref[...]
    xf = x.astype(jnp.float32)  # reduction in f32 for accuracy
    if power == 2:
        s = jnp.sum(xf * xf, axis=-1, keepdims=True)
        # NOTE: padded tail rows / all-zero rows give rsqrt(0)=inf -> 0*inf=NaN, which matches
        # PyTorch's x/0 semantics; padded rows are clipped on writeback, so don't "fix" this
        # with extra masking.
        inv = lax.rsqrt(s)  # EUP op; leaves the VALU free for the scale multiply
    elif isinstance(power, int):
        # integer_pow is a few VPU multiplies and (unlike float pow) handles negative bases
        # for odd powers exactly like PyTorch's x.pow(n).
        s = jnp.sum(lax.integer_pow(xf, power), axis=-1, keepdims=True)
        inv = jnp.power(s, -1.0 / power)  # root only on the (TILE_B, 1) row sums
    else:
        # TODO(synk): non-integer powers lower through exp/log over the full tile (EUP-bound).
        s = jnp.sum(jnp.power(xf, power), axis=-1, keepdims=True)
        inv = jnp.power(s, -1.0 / power)

    if x.dtype == jnp.float32:
        o_ref[...] = (xf * inv).astype(o_ref.dtype)
    else:
        # bf16/fp8-class inputs: scale the native-dtype data (no full-tile f32 materialization
        # on the output path; bf16 VALU exists on v6e/v7x).
        o_ref[...] = (x * inv.astype(x.dtype)).astype(o_ref.dtype)


def normalize_ref(x: jax.Array, power=2) -> jax.Array:
    """Pure-JAX reference mirroring the PyTorch forward exactly."""
    xp = lax.integer_pow(x, power) if isinstance(power, int) else jnp.power(x, power)
    norm = jnp.power(jnp.sum(xp, axis=1, keepdims=True), 1.0 / power)
    return x / norm


def normalize(x: jax.Array, *, power=2, tile_b: int | None = None,
              force_pallas: bool = False) -> jax.Array:
    """L^power normalization along axis 1 of a (batch, features) array."""
    B, D = x.shape
    itemsize = jnp.dtype(x.dtype).itemsize

    # Small-problem fast path: for tiny inputs the pallas_call dispatch + fixed per-step /
    # DMA-latency cost dwarfs the streaming work on every TPU generation.
    if not force_pallas and B * D * itemsize < _MIN_PALLAS_BYTES:
        return normalize_ref(x, power)

    # Pad features to a lane multiple so output stores are unmasked, lane-dense vst.
    # Zero padding contributes nothing to the sum for power > 0, so results are unchanged.
    D_pad = _round_up(D, 128)
    x_in = x if D_pad == D else jnp.pad(x, ((0, 0), (0, D_pad - D)))

    vmem_tile_budget, vmem_limit, num_cores = _tpu_config()
    if tile_b is None:
        tile_b = _pick_tile_b(B, D_pad, x.dtype, vmem_tile_budget, num_cores)

    kernel = functools.partial(_normalize_kernel, power=power)
    # TODO(synk): once per-step-traffic tiling is validated on v7x, sweep
    # pipeline_mode=pl.Buffered(3) on the in/out BlockSpecs (low single-digit % win).
    out = pl.pallas_call(
        kernel,
        out_shape=jax.ShapeDtypeStruct((B, D_pad), x.dtype),
        grid_spec=pltpu.PrefetchScalarGridSpec(
            num_scalar_prefetch=0,
            grid=(pl.cdiv(B, tile_b),),
            in_specs=[pl.BlockSpec((tile_b, D_pad), lambda i: (i, 0))],
            out_specs=pl.BlockSpec((tile_b, D_pad), lambda i: (i, 0)),
        ),
        compiler_params=pltpu.CompilerParams(
            dimension_semantics=("parallel",),
            vmem_limit_bytes=vmem_limit,
        ),
        cost_estimate=pl.CostEstimate(
            flops=3 * B * D_pad,
            transcendentals=B,
            bytes_accessed=2 * B * D_pad * itemsize,
        ),
    )(x_in)
    return out if D_pad == D else out[:, :D]


if __name__ == "__main__":
    key = jax.random.PRNGKey(0)

    # Module-consistent shape: batch=8 contrastive feature vectors of dim 128.
    x = jax.random.normal(key, (8, 128), dtype=jnp.float32)
    ref = normalize_ref(x)

    # Default path: this tiny input takes the XLA fast path (Pallas launch overhead dominates).
    out_fast = normalize(x)
    jax.block_until_ready(out_fast)
    assert out_fast.shape == x.shape and out_fast.dtype == x.dtype
    assert jnp.allclose(out_fast, ref, atol=1e-5, rtol=1e-5)

    # Explicitly exercise the Pallas kernel on the same small shape.
    out_kern = normalize(x, force_pallas=True)
    jax.block_until_ready(out_kern)
    assert out_kern.shape == x.shape and out_kern.dtype == x.dtype
    assert jnp.allclose(out_kern, ref, atol=1e-5, rtol=1e-5)

    # Non-divisible batch (cdiv grid + padded tail block) and a non-128-multiple feature dim
    # (wrapper pads D to the next lane multiple and slices back).
    x2 = jax.random.normal(jax.random.PRNGKey(1), (24, 96), dtype=jnp.float32)
    out2 = normalize(x2, force_pallas=True)
    jax.block_until_ready(out2)
    assert jnp.allclose(out2, normalize_ref(x2), atol=1e-5, rtol=1e-5)

    # General integer-power path (lax.integer_pow + root on the (tile_b, 1) sums).
    x3 = jax.random.normal(jax.random.PRNGKey(2), (16, 128), dtype=jnp.float32)
    out3 = normalize(x3, power=4, force_pallas=True)
    jax.block_until_ready(out3)
    assert jnp.allclose(out3, normalize_ref(x3, power=4), atol=1e-5, rtol=1e-5)

    print("KERNEL_OK")
</pallas_src>

<mosaic_0001>
module attributes {stable_mosaic.version = 11 : i64} {
  func.func @_normalize_kernel(%arg0: i32, %arg1: memref<8x128xf32, #tpu.memory_space<vmem>>, %arg2: memref<8x128xf32, #tpu.memory_space<vmem>>) attributes {dimension_semantics = [#tpu.dimension_semantics<parallel>], iteration_bounds = array<i64: 1>, scalar_prefetch = 0 : i64, scratch_operands = 0 : i64, tpu.core_type = #tpu.core_type<tc>, window_params = [{transform_indices = @transform_0, window_bounds = array<i64: 8, 128>}, {transform_indices = @transform_1, window_bounds = array<i64: 8, 128>}]} {
    %c0 = arith.constant 0 : index
    %c0_0 = arith.constant 0 : index
    %0 = vector.load %arg1[%c0, %c0_0] : memref<8x128xf32, #tpu.memory_space<vmem>>, vector<8x128xf32>
    %1 = arith.mulf %0, %0 : vector<8x128xf32>
    %cst = arith.constant dense<0.000000e+00> : vector<8xf32>
    %2 = vector.multi_reduction <add>, %1, %cst [1] : vector<8x128xf32> to vector<8xf32>
    %3 = vector.shape_cast %2 : vector<8xf32> to vector<8x1xf32>
    %4 = math.rsqrt %3 : vector<8x1xf32>
    %5 = vector.broadcast %4 : vector<8x1xf32> to vector<8x128xf32>
    %6 = arith.mulf %0, %5 : vector<8x128xf32>
    %c0_1 = arith.constant 0 : index
    %c0_2 = arith.constant 0 : index
    %7 = vector.load %arg2[%c0_1, %c0_2] : memref<8x128xf32, #tpu.memory_space<vmem>>, vector<8x128xf32>
    tpu.vector_store %arg2[%c0_1, %c0_2], %6 {strides = array<i32>} : memref<8x128xf32, #tpu.memory_space<vmem>>, vector<8x128xf32>,
    return
  }
  func.func @transform_0(%arg0: i32) -> (i32, i32) {
    %c0_i32 = arith.constant 0 : i32
    %c0_i32_0 = arith.constant 0 : i32
    return %arg0, %c0_i32 : i32, i32
  }
  func.func @transform_1(%arg0: i32) -> (i32, i32) {
    %c0_i32 = arith.constant 0 : i32
    %c0_i32_0 = arith.constant 0 : i32
    return %arg0, %c0_i32 : i32, i32
  }
}

</mosaic_0001>

<bundles_post_ra>
// kernel: tpu_custom_call.1
= control target key start
LH: loop header
LB: loop body
LE: loop exit
PB: predicated region body
PF: predicated region fallthrough
CT: control target
= control target key end

     0   :  { %6 = vsyncpa [#allocation3], 0  ;;  %s109_s0 = inlined_call_operand.hbm [shape: f32[8,128], index: 0, kind: input, shape index: {}]   ;;  %s110_s1 = inlined_call_operand.hbm [shape: f32[8,128], index: 1, kind: output, shape index: {}]  }
   0x1   :  { %7 = vsyncpa [#allocation4], 0  ;;  %s91_s6 = smov [#allocation2]  }
   0x2   :  { %s14_s7 = sshll.u32 %s91_s6, 4  ;;  %s15_s7 = int_to_ptr.vmem [resolvable:$true] %s14_s7 }
   0x3   :  { %s55_s8 = scalar_lea.vmem %s15_s7, 128  ;;  %p60_p1 = scmp.lt.s32.totalorder %s15_s7, %s15_s7 }
   0x4   :  { %p56_p0 = scmp.ne.s32.totalorder %s15_s7, %s55_s8  ;;  %p61_p2 = scmp.lt.s32.totalorder %s55_s8, %s55_s8 }
   0x6   :  { %p62_p3 = por %p61_p2, %p60_p1 }
   0x8   :  { %p63_p4 = pnand %p62_p3, %p56_p0 }
   0xa   :  { %66 = shalt.err (!%p63_p4)
}
   0xb   :  { %17 = dma.hbm_to_vmem [thread:$0]  %s109_s0, 128, %s15_s7, [#allocation3]  }
   0xc   :  { %87 = dma.done.wait [#allocation3], 128  }
   0xd   :  { %88 = vsyncadd [#allocation3], 4294967168  ;;  %v21_v0 = vld [vmem:[#allocation2] sm:$0xff]  ;;  %s92_s11 = smov [#allocation5]  }
   0xe   :  { %v22_v1 = vmul.f32 %v21_v0, %v21_v0  ;;  %s34_s12 = sshll.u32 %s92_s11, 4  ;;  %s35_s12 = int_to_ptr.vmem [resolvable:$true] %s34_s12 }
   0xf   :  { %s67_s13 = scalar_lea.vmem %s35_s12, 128  ;;  %p72_p6 = scmp.lt.s32.totalorder %s35_s12, %s35_s12 }
  0x10   :  { %23 = vadd.xlane.f32.xlu0 %v22_v1  ;;  %p68_p5 = scmp.ne.s32.totalorder %s35_s12, %s67_s13  ;;  %p73_p7 = scmp.lt.s32.totalorder %s67_s13, %s67_s13 }
  0x12   :  { %p74_p8 = por %p73_p7, %p72_p6 }
  0x14   :  { %p75_p9 = pnand %p74_p8, %p68_p5 }
  0x99   :  { %v24_v2 = vpop.xlane.xlu0 %23 }
  0x9a   :  { %45 = vrsqrt.f32 %v24_v2 }
  0xa7   :  { %v46_v3 = vpop.eup %45 }
  0xa8   :  { %v26_v4 = vmul.f32 %v46_v3, %v21_v0 }
  0xaa   :  { %27 = vst [vmem:[#allocation5] sm:$0xff] %v26_v4 }
  0xab   :  { %78 = shalt.err (!%p75_p9)
}
  0xac   :  { %37 = dma.vmem_to_hbm [thread:$0]  %s35_s12, 128, %s110_s1, [#allocation4]  }
  0xad   :  { %89 = dma.done.wait [#allocation4], 128  }
  0xae   :  { %90 = vsyncadd [#allocation4], 4294967168 }
  0xaf   :  { %41 = vsyncpa [#allocation3], 1 }
  0xb0   :  { %42 = vsyncpa [#allocation4], 1 }

</bundles_post_ra>
